<compile_context>
chip_gen: v6e
topology: v6e:2x2x1
jax: 0.10.0
libtpu: 0.0.40
codegen_flags: <defaults>
</compile_context>

<pallas_src>
import functools

import jax
import jax.numpy as jnp
from jax.experimental import pallas as pl
from jax.experimental.pallas import tpu as pltpu

C_IN = 4
C_OUT = 32
KH = KW = 3
PAD = 1
BN_EPS = 1e-5

# Output dtype of the featurizer (set to jnp.float32 if an f32 map is needed).
OUT_DTYPE = jnp.bfloat16

# Tiling knobs.
MAX_PIXELS_PER_BLOCK = 32 * 1024   # ~2 MiB of bf16 output per grid step
MIN_GRID_STEPS = 4                 # >=2 steps per TensorCore on v7x (2 TCs)


def _mod(a, d):
    """a % d for non-negative a; lane-cheap AND when d is a power of two."""
    if d & (d - 1) == 0:
        return a & (d - 1)
    return a % d


def _conv_bn_relu_kernel(x_ref, w_ref, shift_ref, o_ref, x3_ref, p_ref, *, h, w):
    """One grid step: nb images -> fused im2col -> ONE matmul -> +shift -> ReLU.

    x_ref:     (C_IN, NPIX)        bf16  channel-major pixels, NPIX = nb*h*w
    w_ref:     (C_OUT, KH*KW*C_IN) bf16  conv weights (BN scale folded),
                                         column k = dj*(KH*C_IN) + di*C_IN + c
    shift_ref: (C_OUT, 1)          f32   BN shift (beta - mean*gamma/std)
    o_ref:     (nb, C_OUT, h*w)          per-image channel-major output block
    x3_ref:    (KH*C_IN, NPIX)     bf16  scratch: row-shifted taps
    p_ref:     (KH*KW*C_IN, NPIX)  bf16  scratch: patch matrix, K on sublanes
    """
    nb, _, hw = o_ref.shape
    npix = x_ref.shape[1]
    x = x_ref[...]                                       # (C_IN, NPIX) bf16

    # Border masks: zero-padding is emulated with lane shifts + masks.  Lane L
    # maps to pixel (i, j) of some image with i = (L % (h*w)) // w, j = L % w.
    lane = jax.lax.broadcasted_iota(jnp.int32, (1, npix), 1)
    col = _mod(lane, w)
    pix = _mod(lane, h * w)
    row_ok_lo = pix >= w                  # i >= 1      (needed for di == 0)
    row_ok_hi = pix < (h - 1) * w         # i <= h - 2  (needed for di == 2)
    col_ok_lo = col >= 1                  # j >= 1      (needed for dj == 0)
    col_ok_hi = col <= w - 2              # j <= w - 2  (needed for dj == 2)

    def lane_shift(v, s):
        # result[..., L] = v[..., (L + s) % NPIX], s a static Python int.
        # Wrapped-in lanes are always killed by the border masks below.
        if s == 0:
            return v
        return jnp.concatenate([v[:, s:], v[:, :s]], axis=-1)

    # Stage 1: three row-shifted (di) copies, packed on sublanes via scratch.
    for di in range(KH):
        v = lane_shift(x, (di - 1) * w)
        if di == 0:
            v = jnp.where(row_ok_lo, v, 0.0).astype(x.dtype)
        elif di == KH - 1:
            v = jnp.where(row_ok_hi, v, 0.0).astype(x.dtype)
        x3_ref[di * C_IN:(di + 1) * C_IN, :] = v
    x3 = x3_ref[...]                                     # (KH*C_IN, NPIX)

    # Stage 2: three column-shifted (dj) copies -> full 36-row patch matrix.
    for dj in range(KW):
        v = lane_shift(x3, dj - 1)
        if dj == 0:
            v = jnp.where(col_ok_lo, v, 0.0).astype(x3.dtype)
        elif dj == KW - 1:
            v = jnp.where(col_ok_hi, v, 0.0).astype(x3.dtype)
        p_ref[dj * KH * C_IN:(dj + 1) * KH * C_IN, :] = v

    # One batched MXU contraction for the whole block: (C_OUT,36) @ (36, NPIX).
    acc = jnp.dot(w_ref[...], p_ref[...], preferred_element_type=jnp.float32)
    res = jnp.maximum(acc + shift_ref[...], 0.0).astype(o_ref.dtype)

    # Per-image stores: aligned lane slices of the batched result (hw = 256
    # here, a multiple of 128 -> unmasked lane-dense stores), so the global
    # (B, C_OUT, h*w) output reshapes to NCHW for free.
    for m in range(nb):
        o_ref[m] = res[:, m * hw:(m + 1) * hw]


def _pick_images_per_block(batch, pix_per_image):
    """Images per grid step: large blocks, but keep enough grid steps for
    pipelining and so both v7x TensorCores get work."""
    max_nb = max(1, MAX_PIXELS_PER_BLOCK // pix_per_image)
    nb = min(batch, max_nb)
    target_steps = min(batch, MIN_GRID_STEPS)
    nb = min(nb, -(-batch // target_steps))   # ceil(batch / target_steps)
    return max(1, nb)


def _vmem_limit_bytes():
    """Generation-aware VMEM budget (~3/4 of physical; v7x only has 64 MiB)."""
    try:
        phys = pltpu.get_tpu_info().vmem_capacity_bytes
    except Exception:
        phys = 64 * 1024 * 1024   # conservative default (v7x-sized)
    return int(min(phys * 3 // 4, 100 * 1024 * 1024))


@jax.jit
def _featurizer_4d(x_nchw, w_folded, shift):
    """Conv3x3(pad=1) + eval-mode BN (folded) + ReLU on a 4D NCHW batch."""
    B, C, H, W = x_nchw.shape
    n_out = w_folded.shape[0]
    HW = H * W

    # Channel-major pixel-flat bf16 operand (C_IN, B*H*W).  No spatial padding:
    # the kernel emulates it with lane shifts + border masks, so this prep is a
    # single transpose+cast pass over the (small) input.
    # TODO(synk): if the producer can emit channel-major bf16 activations
    # directly, this prep pass and its HBM round trip disappear entirely.
    x_cm = jnp.transpose(x_nchw, (1, 0, 2, 3)).reshape(C, B * HW)
    x_cm = x_cm.astype(jnp.bfloat16)

    nb = _pick_images_per_block(B, HW)
    grid = pl.cdiv(B, nb)
    b_pad = grid * nb
    if b_pad != B:                       # tail block: pad with zero images
        x_cm = jnp.pad(x_cm, ((0, 0), (0, (b_pad - B) * HW)))
    npix = nb * HW

    kernel = functools.partial(_conv_bn_relu_kernel, h=H, w=W)
    out = pl.pallas_call(
        kernel,
        out_shape=jax.ShapeDtypeStruct((b_pad, n_out, HW), OUT_DTYPE),
        grid_spec=pltpu.PrefetchScalarGridSpec(
            num_scalar_prefetch=0,
            grid=(grid,),
            in_specs=[
                pl.BlockSpec((C, npix), lambda b: (0, b)),        # pixels
                pl.BlockSpec(w_folded.shape, lambda b: (0, 0)),   # weights
                pl.BlockSpec(shift.shape, lambda b: (0, 0)),      # bn shift
            ],
            out_specs=pl.BlockSpec((nb, n_out, HW), lambda b: (b, 0, 0)),
            scratch_shapes=[
                pltpu.VMEM((KH * C_IN, npix), jnp.bfloat16),        # x3
                pltpu.VMEM((KH * KW * C_IN, npix), jnp.bfloat16),   # patches
            ],
        ),
        compiler_params=pltpu.CompilerParams(
            dimension_semantics=("parallel",),
            vmem_limit_bytes=_vmem_limit_bytes(),
        ),
    )(x_cm, w_folded, shift)

    if b_pad != B:
        out = out[:B]
    # (B, C_OUT, H*W) -> (B, C_OUT, H, W): contiguous trailing split, free.
    return out.reshape(B, n_out, H, W)


def base_featurizer_forward(x, params):
    """Mirrors BaseFeaturizer.forward: handles 4D and 5D inputs."""
    w_folded, shift = params
    if x.ndim == 5:
        B, T, C, H, W = x.shape
        feats = _featurizer_4d(x.reshape(B * T, C, H, W), w_folded, shift)
        _, c, h, w = feats.shape
        return feats.reshape(B, T, c, h, w)
    elif x.ndim == 4:
        return _featurizer_4d(x, w_folded, shift)
    else:
        raise ValueError("Only 2D or 3D data supported.")


def make_params(key):
    """Deterministic synthetic conv + batchnorm params (BN folded for the kernel)."""
    k_w, k_g, k_b, k_m, k_v = jax.random.split(key, 5)
    # PyTorch Conv2d weight layout: (C_out, C_in, KH, KW)
    w_oihw = jax.random.normal(k_w, (C_OUT, C_IN, KH, KW), jnp.float32) * 0.1
    gamma = 1.0 + 0.1 * jax.random.normal(k_g, (C_OUT,), jnp.float32)
    beta = 0.1 * jax.random.normal(k_b, (C_OUT,), jnp.float32)
    run_mean = 0.1 * jax.random.normal(k_m, (C_OUT,), jnp.float32)
    run_var = jnp.abs(1.0 + 0.1 * jax.random.normal(k_v, (C_OUT,), jnp.float32))
    # Fold eval-mode BN scale into the conv weights; keep only the shift.
    # TODO(synk): training-mode (batch-statistic) BN path not implemented;
    # eval/running-stats semantics only.
    inv_std = gamma / jnp.sqrt(run_var + BN_EPS)                        # (C_OUT,)
    # Column k = dj*(KH*C_IN) + di*C_IN + c, matching the kernel's tap order:
    # (O, C, KH, KW) -> (O, KW, KH, C) -> (O, 36).
    w_t = jnp.transpose(w_oihw, (0, 3, 2, 1)).reshape(C_OUT, KH * KW * C_IN)
    w_folded = (w_t * inv_std[:, None]).astype(jnp.bfloat16)
    shift = (beta - run_mean * inv_std).reshape(C_OUT, 1).astype(jnp.float32)
    return w_folded, shift, w_oihw, gamma, beta, run_mean, run_var


def _reference_4d(x_nchw, w_oihw, gamma, beta, mean, var):
    """Pure-JAX f32 reference (lax conv) for a correctness check."""
    y = jax.lax.conv_general_dilated(
        x_nchw, w_oihw, window_strides=(1, 1), padding=((PAD, PAD), (PAD, PAD)),
        dimension_numbers=("NCHW", "OIHW", "NCHW"))
    s = (gamma / jnp.sqrt(var + BN_EPS)).reshape(1, C_OUT, 1, 1)
    b = (beta - mean * gamma / jnp.sqrt(var + BN_EPS)).reshape(1, C_OUT, 1, 1)
    return jnp.maximum(y * s + b, 0.0)


if __name__ == "__main__":
    key = jax.random.PRNGKey(0)
    k_params, k_x4, k_x5 = jax.random.split(key, 3)
    w_folded, shift, w_oihw, gamma, beta, rmean, rvar = make_params(k_params)
    params = (w_folded, shift)

    # bf16 operands and bf16 output -> relaxed tolerance vs f32 reference.
    ATOL = RTOL = 5e-2

    # 4D input: batch of images (B, C, H, W)
    x4 = jax.random.normal(k_x4, (2, C_IN, 16, 16), jnp.float32)
    feats4 = jax.block_until_ready(base_featurizer_forward(x4, params))
    assert feats4.shape == (2, C_OUT, 16, 16), feats4.shape
    ref4 = _reference_4d(x4, w_oihw, gamma, beta, rmean, rvar)
    assert jnp.allclose(feats4.astype(jnp.float32), ref4, atol=ATOL, rtol=RTOL), \
        "4D mismatch vs reference"

    # 5D input: batch of image sequences (B, T, C, H, W)
    x5 = jax.random.normal(k_x5, (2, 4, C_IN, 16, 16), jnp.float32)
    feats5 = jax.block_until_ready(base_featurizer_forward(x5, params))
    assert feats5.shape == (2, 4, C_OUT, 16, 16), feats5.shape
    ref5 = _reference_4d(x5.reshape(8, C_IN, 16, 16), w_oihw, gamma, beta,
                         rmean, rvar).reshape(2, 4, C_OUT, 16, 16)
    assert jnp.allclose(feats5.astype(jnp.float32), ref5, atol=ATOL, rtol=RTOL), \
        "5D mismatch vs reference"

    print("KERNEL_OK")
</pallas_src>

<mosaic_0001>
module attributes {stable_mosaic.version = 11 : i64} {
  func.func @_conv_bn_relu_kernel(%arg0: i32, %arg1: memref<4x256xbf16, #tpu.memory_space<vmem>>, %arg2: memref<32x36xbf16, #tpu.memory_space<vmem>>, %arg3: memref<32x1xf32, #tpu.memory_space<vmem>>, %arg4: memref<1x32x256xbf16, #tpu.memory_space<vmem>>, %arg5: memref<12x256xbf16, #tpu.memory_space<vmem>>, %arg6: memref<36x256xbf16, #tpu.memory_space<vmem>>) attributes {dimension_semantics = [#tpu.dimension_semantics<parallel>], iteration_bounds = array<i64: 2>, scalar_prefetch = 0 : i64, scratch_operands = 2 : i64, tpu.core_type = #tpu.core_type<tc>, window_params = [{transform_indices = @transform_0, window_bounds = array<i64: 4, 256>}, {pipeline_mode = #tpu.pipeline_mode<synchronous>, transform_indices = @transform_1, window_bounds = array<i64: 32, 36>}, {pipeline_mode = #tpu.pipeline_mode<synchronous>, transform_indices = @transform_2, window_bounds = array<i64: 32, 1>}, {transform_indices = @transform_3, window_bounds = array<i64: 1, 32, 256>}]} {
    %c0 = arith.constant 0 : index
    %c0_0 = arith.constant 0 : index
    %0 = vector.load %arg1[%c0, %c0_0] : memref<4x256xbf16, #tpu.memory_space<vmem>>, vector<4x256xbf16>
    %1 = tpu.iota {dimensions = array<i32: 1>} : vector<1x256xi32>
    %c15_i32 = arith.constant 15 : i32
    %2 = vector.broadcast %c15_i32 : i32 to vector<1x256xi32>
    %3 = arith.andi %1, %2 : vector<1x256xi32>
    %c255_i32 = arith.constant 255 : i32
    %4 = vector.broadcast %c255_i32 : i32 to vector<1x256xi32>
    %5 = arith.andi %1, %4 : vector<1x256xi32>
    %c16_i32 = arith.constant 16 : i32
    %6 = vector.broadcast %c16_i32 : i32 to vector<1x256xi32>
    %7 = arith.cmpi sge, %5, %6 : vector<1x256xi32>
    %c240_i32 = arith.constant 240 : i32
    %8 = vector.broadcast %c240_i32 : i32 to vector<1x256xi32>
    %9 = arith.cmpi slt, %5, %8 : vector<1x256xi32>
    %c1_i32 = arith.constant 1 : i32
    %10 = vector.broadcast %c1_i32 : i32 to vector<1x256xi32>
    %11 = arith.cmpi sge, %3, %10 : vector<1x256xi32>
    %c14_i32 = arith.constant 14 : i32
    %12 = vector.broadcast %c14_i32 : i32 to vector<1x256xi32>
    %13 = arith.cmpi sle, %3, %12 : vector<1x256xi32>
    %14 = vector.extract_strided_slice %0 {offsets = [0, 240], sizes = [4, 16], strides = [1, 1]} : vector<4x256xbf16> to vector<4x16xbf16>
    %15 = vector.extract_strided_slice %0 {offsets = [0, 0], sizes = [4, 240], strides = [1, 1]} : vector<4x256xbf16> to vector<4x240xbf16>
    %16 = tpu.concatenate %14, %15 in 1 : vector<4x16xbf16>, vector<4x240xbf16> -> vector<4x256xbf16>
    %cst = arith.constant 0.000000e+00 : f32
    %17 = arith.truncf %cst : f32 to bf16
    %18 = vector.shape_cast %7 : vector<1x256xi1> to vector<1x256xi1>
    %19 = vector.broadcast %18 : vector<1x256xi1> to vector<4x256xi1>
    %20 = vector.broadcast %17 : bf16 to vector<4x256xbf16>
    %21 = arith.select %19, %16, %20 : vector<4x256xi1>, vector<4x256xbf16>
    %c0_1 = arith.constant 0 : index
    %c0_2 = arith.constant 0 : index
    %22 = vector.load %arg5[%c0_1, %c0_2] : memref<12x256xbf16, #tpu.memory_space<vmem>>, vector<4x256xbf16>
    tpu.vector_store %arg5[%c0_1, %c0_2], %21 {strides = array<i32>} : memref<12x256xbf16, #tpu.memory_space<vmem>>, vector<4x256xbf16>,
    %c4 = arith.constant 4 : index
    %c0_3 = arith.constant 0 : index
    %23 = vector.load %arg5[%c4, %c0_3] : memref<12x256xbf16, #tpu.memory_space<vmem>>, vector<4x256xbf16>
    tpu.vector_store %arg5[%c4, %c0_3], %0 {strides = array<i32>} : memref<12x256xbf16, #tpu.memory_space<vmem>>, vector<4x256xbf16>,
    %24 = vector.extract_strided_slice %0 {offsets = [0, 16], sizes = [4, 240], strides = [1, 1]} : vector<4x256xbf16> to vector<4x240xbf16>
    %25 = vector.extract_strided_slice %0 {offsets = [0, 0], sizes = [4, 16], strides = [1, 1]} : vector<4x256xbf16> to vector<4x16xbf16>
    %26 = tpu.concatenate %24, %25 in 1 : vector<4x240xbf16>, vector<4x16xbf16> -> vector<4x256xbf16>
    %cst_4 = arith.constant 0.000000e+00 : f32
    %27 = arith.truncf %cst_4 : f32 to bf16
    %28 = vector.shape_cast %9 : vector<1x256xi1> to vector<1x256xi1>
    %29 = vector.broadcast %28 : vector<1x256xi1> to vector<4x256xi1>
    %30 = vector.broadcast %27 : bf16 to vector<4x256xbf16>
    %31 = arith.select %29, %26, %30 : vector<4x256xi1>, vector<4x256xbf16>
    %c8 = arith.constant 8 : index
    %c0_5 = arith.constant 0 : index
    %32 = vector.load %arg5[%c8, %c0_5] : memref<12x256xbf16, #tpu.memory_space<vmem>>, vector<4x256xbf16>
    tpu.vector_store %arg5[%c8, %c0_5], %31 {strides = array<i32>} : memref<12x256xbf16, #tpu.memory_space<vmem>>, vector<4x256xbf16>,
    %c0_6 = arith.constant 0 : index
    %c0_7 = arith.constant 0 : index
    %33 = vector.load %arg5[%c0_6, %c0_7] : memref<12x256xbf16, #tpu.memory_space<vmem>>, vector<12x256xbf16>
    %34 = vector.extract_strided_slice %33 {offsets = [0, 255], sizes = [12, 1], strides = [1, 1]} : vector<12x256xbf16> to vector<12x1xbf16>
    %35 = vector.extract_strided_slice %33 {offsets = [0, 0], sizes = [12, 255], strides = [1, 1]} : vector<12x256xbf16> to vector<12x255xbf16>
    %36 = tpu.concatenate %34, %35 in 1 : vector<12x1xbf16>, vector<12x255xbf16> -> vector<12x256xbf16>
    %cst_8 = arith.constant 0.000000e+00 : f32
    %37 = arith.truncf %cst_8 : f32 to bf16
    %38 = vector.shape_cast %11 : vector<1x256xi1> to vector<1x256xi1>
    %39 = vector.broadcast %38 : vector<1x256xi1> to vector<12x256xi1>
    %40 = vector.broadcast %37 : bf16 to vector<12x256xbf16>
    %41 = arith.select %39, %36, %40 : vector<12x256xi1>, vector<12x256xbf16>
    %c0_9 = arith.constant 0 : index
    %c0_10 = arith.constant 0 : index
    %42 = vector.load %arg6[%c0_9, %c0_10] : memref<36x256xbf16, #tpu.memory_space<vmem>>, vector<12x256xbf16>
    tpu.vector_store %arg6[%c0_9, %c0_10], %41 {strides = array<i32>} : memref<36x256xbf16, #tpu.memory_space<vmem>>, vector<12x256xbf16>,
    %c12 = arith.constant 12 : index
    %c0_11 = arith.constant 0 : index
    %43 = vector.load %arg6[%c12, %c0_11] : memref<36x256xbf16, #tpu.memory_space<vmem>>, vector<12x256xbf16>
    tpu.vector_store %arg6[%c12, %c0_11], %33 {strides = array<i32>} : memref<36x256xbf16, #tpu.memory_space<vmem>>, vector<12x256xbf16>,
    %44 = vector.extract_strided_slice %33 {offsets = [0, 1], sizes = [12, 255], strides = [1, 1]} : vector<12x256xbf16> to vector<12x255xbf16>
    %45 = vector.extract_strided_slice %33 {offsets = [0, 0], sizes = [12, 1], strides = [1, 1]} : vector<12x256xbf16> to vector<12x1xbf16>
    %46 = tpu.concatenate %44, %45 in 1 : vector<12x255xbf16>, vector<12x1xbf16> -> vector<12x256xbf16>
    %cst_12 = arith.constant 0.000000e+00 : f32
    %47 = arith.truncf %cst_12 : f32 to bf16
    %48 = vector.shape_cast %13 : vector<1x256xi1> to vector<1x256xi1>
    %49 = vector.broadcast %48 : vector<1x256xi1> to vector<12x256xi1>
    %50 = vector.broadcast %47 : bf16 to vector<12x256xbf16>
    %51 = arith.select %49, %46, %50 : vector<12x256xi1>, vector<12x256xbf16>
    %c24 = arith.constant 24 : index
    %c0_13 = arith.constant 0 : index
    %52 = vector.load %arg6[%c24, %c0_13] : memref<36x256xbf16, #tpu.memory_space<vmem>>, vector<12x256xbf16>
    tpu.vector_store %arg6[%c24, %c0_13], %51 {strides = array<i32>} : memref<36x256xbf16, #tpu.memory_space<vmem>>, vector<12x256xbf16>,
    %c0_14 = arith.constant 0 : index
    %c0_15 = arith.constant 0 : index
    %53 = vector.load %arg2[%c0_14, %c0_15] : memref<32x36xbf16, #tpu.memory_space<vmem>>, vector<32x36xbf16>
    %c0_16 = arith.constant 0 : index
    %c0_17 = arith.constant 0 : index
    %54 = vector.load %arg6[%c0_16, %c0_17] : memref<36x256xbf16, #tpu.memory_space<vmem>>, vector<36x256xbf16>
    %cst_18 = arith.constant dense<0.000000e+00> : vector<32x256xf32>
    %55 = tpu.matmul %53, %54, %cst_18 {dimension_numbers = #tpu.dot_dimension_numbers<[1], [0], [0], [1], [0, 0, 1, 1], [], []>} : vector<32x36xbf16>, vector<36x256xbf16>, vector<32x256xf32> -> vector<32x256xf32>
    %c0_19 = arith.constant 0 : index
    %c0_20 = arith.constant 0 : index
    %56 = vector.load %arg3[%c0_19, %c0_20] : memref<32x1xf32, #tpu.memory_space<vmem>>, vector<32x1xf32>
    %57 = vector.broadcast %56 : vector<32x1xf32> to vector<32x256xf32>
    %58 = arith.addf %55, %57 : vector<32x256xf32>
    %cst_21 = arith.constant 0.000000e+00 : f32
    %59 = vector.broadcast %cst_21 : f32 to vector<32x256xf32>
    %60 = arith.maximumf %58, %59 : vector<32x256xf32>
    %61 = arith.truncf %60 : vector<32x256xf32> to vector<32x256xbf16>
    %c0_22 = arith.constant 0 : index
    %c0_23 = arith.constant 0 : index
    %c0_24 = arith.constant 0 : index
    %62 = vector.load %arg4[%c0_22, %c0_23, %c0_24] : memref<1x32x256xbf16, #tpu.memory_space<vmem>>, vector<1x32x256xbf16>
    %63 = vector.shape_cast %62 : vector<1x32x256xbf16> to vector<32x256xbf16>
    %64 = vector.shape_cast %61 : vector<32x256xbf16> to vector<1x32x256xbf16>
    tpu.vector_store %arg4[%c0_22, %c0_23, %c0_24], %64 {strides = array<i32>} : memref<1x32x256xbf16, #tpu.memory_space<vmem>>, vector<1x32x256xbf16>,
    return
  }
  func.func @transform_0(%arg0: i32) -> (i32, i32) {
    %c0_i32 = arith.constant 0 : i32
    %c0_i32_0 = arith.constant 0 : i32
    return %c0_i32, %arg0 : i32, i32
  }
  func.func @transform_1(%arg0: i32) -> (i32, i32) {
    %c0_i32 = arith.constant 0 : i32
    %c0_i32_0 = arith.constant 0 : i32
    %c0_i32_1 = arith.constant 0 : i32
    return %c0_i32, %c0_i32_0 : i32, i32
  }
  func.func @transform_2(%arg0: i32) -> (i32, i32) {
    %c0_i32 = arith.constant 0 : i32
    %c0_i32_0 = arith.constant 0 : i32
    %c0_i32_1 = arith.constant 0 : i32
    return %c0_i32, %c0_i32_0 : i32, i32
  }
  func.func @transform_3(%arg0: i32) -> (i32, i32, i32) {
    %c0_i32 = arith.constant 0 : i32
    %c0_i32_0 = arith.constant 0 : i32
    %c0_i32_1 = arith.constant 0 : i32
    return %arg0, %c0_i32, %c0_i32_0 : i32, i32, i32
  }
}

</mosaic_0001>

<bundles_post_ra>
// kernel: _featurizer_4d.1
= control target key start
LH: loop header
LB: loop body
LE: loop exit
PB: predicated region body
PF: predicated region fallthrough
CT: control target
= control target key end

     0   :  { %s723_s12 = smov 0   ;;  %s796_s0 = inlined_call_operand.vmem [shape: bf16[4,512], index: 0, kind: input, shape index: {}]   ;;  %s797_s1 = inlined_call_operand.vmem [shape: bf16[32,36], index: 1, kind: input, shape index: {}]   ;;  %s798_s2 = inlined_call_operand.vmem [shape: f32[32,1], index: 2, kind: input, shape index: {}]   ;;  %s799_s3 = inlined_call_operand.vmem [shape: bf16[2,32,256], index: 3, kind: output, shape index: {}]  }
   0x1 LB: > { %s729_s13 = sadd.s32 4294967295, %s694_s12   ;;  %p620_p0 = scmp.ge.s32.totalorder %s694_s12, 1  ;;  %s694_s12 = sphi %s723_s12, %s13_s12  }
   0x2   : > { %p138_p1 = scmp.lt.s32.totalorder %s694_s12, 3 }
   0x4   : > { %p139_p2 = pnand %p620_p0, %p138_p1 }
   0x5   : > { %s621_s14 = sshll.u32 (!%p139_p2), %s729_s13, 1  ;;  %s698_s19 = smov (!%p139_p2), 112  }
   0x6   : > { %142 = sbr.rel (%p139_p2) target bundleno = 502 (0x1f6), region = 32  ;;  %p163_p3 = scmp.lt.s32.totalorder (!%p139_p2), %s621_s14, 3 }
   0x7   : > { %s699_s20 = smov (!%p139_p2), 16   ;;  %s701_s21 = smov (!%p139_p2), 127  }
   0x8   : > { %s702_s22 = smov (!%p139_p2), 1   ;;  %p168_p4 = scmp.lt.s32.totalorder (!%p139_p2), %s729_s13, 1 }
   0xb   : > { %v177_v0 = vlaneseq  ;;  %v696_v1 = vmov 1983009808   ;;  %v697_v3 = vmov 0   ;;  %s801_s14 = smov (!%p163_p3, %s621_s14), 3  ;;  %vm700_vm2 = vmmov 1   ;;  %v400_v45 = vld [vmem:[%s798_s2 + $0x8] sm:$0xff] }
   0xc   : > { %v194_v2 = vunpack.c.l.s4 %v696_v1  ;;  %504 = vmatprep.mubr.bf16.mxu0 %v697_v3  ;;  %514 = vmatprep.mubr.bf16.mxu1 %v697_v3  ;;  %s622_s15 = sshll.u32 %s801_s14, 1  ;;  %vm252_vm5 = vcmask 916480   ;;  %vm205_vm8 = vcmask 130048   ;;  %vm337_vm11 = vcmask 1041408   ;;  %v399_v46 = vld [vmem:[%s798_s2] sm:$0xff]  ;;  %v401_v47 = vld [vmem:[%s798_s2 + $0x10] sm:$0xff] }
   0xd   : > { %v197_v4 = vshrl.u32 %v177_v0, 7  ;;  %678 = vset.pattern.permute.xlu1 %v697_v3  ;;  %677 = vset.pattern.permute.xlu0 %v697_v3  ;;  %s166_s18 = scalar_lea.vmem %s796_s0, %s622_s15  ;;  %v741_v11 = vand.u32 127, %v177_v0  ;;  %vm338_vm12 = vcmask 1045508   ;;  %v402_v48 = vld [vmem:[%s798_s2 + $0x18] sm:$0xff]  ;;  %s803_s13 = smov (!%p168_p4, %s729_s13), 1 }
   0xe   : > { %v195_v5 = vunpack.c.0.s8 %v194_v2  ;;  %v176_v7 = vld [vmem:[%s166_s18] sm:$0xf]  ;;  %vm339_vm13 = vmor %vm337_vm11, %vm338_vm12  ;;  %s651_s8 = sshll.u32 %s803_s13, 5 }
   0xf   : > { %v238_v9 = vcombine.low %v176_v7, %v176_v7  ;;  %v744_v12 = vadd.s32 128, %v741_v11  ;;  %v182_v14 = vand.u32 255, %v741_v11  ;;  %v748_v15 = vsub.s32 0, %v197_v4  ;;  %s172_s11 = scalar_lea.vmem %s799_s3, %s651_s8 }
  0x10   : > { %v198_v6 = vsub.s32 %v195_v5, %v197_v4  ;;  %v750_v16 = vsub.s32 4, %v197_v4  ;;  %v180_v49 = vand.u32 15, %v741_v11 }
  0x11   : > { %626 = vst.sshfl [vmem:[#allocation2] sm:$0xf0 pattern:$0x76325410] %v238_v9  ;;  %v183_v13 = vand.u32 255, %v744_v12  ;;  %vm184_vm1 = vcmp.ge.s32.totalorder %v182_v14, 16 }
  0x12   : > { %v199_v8 = vrot.slane %v176_v7, %v198_v6  ;;  %vm217_vm4 = vmpackc.low %vm700_vm2, %vm184_vm1  ;;  %v181_v50 = vand.u32 15, %v744_v12  ;;  %vm190_vm14 = vcmp.le.s32.totalorder %v180_v49, 14  ;;  %vm188_vm1 = vcmp.ge.s32.totalorder %v180_v49, 1 }
  0x13   : > { %vm187_vm0 = vcmp.lt.s32.totalorder %v183_v13, 240  ;;  %v218_v18 = vsel %vm217_vm4, 65537, %v697_v3  ;;  %vm352_vm4 = vcmask 1039360  }
  0x14   : > { %248 = vrot.lane.b32.xlu1 %v199_v8, %s698_s19  ;;  %v200_v10 = vcombine.high %v199_v8, %v199_v8  ;;  %vm264_vm3 = vmpackc.low %vm187_vm0, %vm700_vm2  ;;  %v222_v22 = vrot.slane %v218_v18, %v748_v15  ;;  %v226_v23 = vrot.slane %v218_v18, %v750_v16  ;;  %vm191_vm15 = vcmp.le.s32.totalorder %v181_v50, 14  ;;  %v684_v18 = vld [vmem:[%s797_s1] sm:$0xff]  }
  0x15   : > { %v265_v17 = vsel %vm264_vm3, 65537, %v697_v3  ;;  %vm364_vm0 = vmpackc.low %vm191_vm15, %vm190_vm14  ;;  %vm189_vm2 = vcmp.ge.s32.totalorder %v181_v50, 1 }
  0x16   : > { %201 = vrot.lane.b32.xlu0 %v200_v10, %s699_s20  ;;  %v269_v19 = vrot.slane %v265_v17, %v748_v15  ;;  %v273_v20 = vrot.slane %v265_v17, %v750_v16  ;;  %vm227_vm9 = vcmp.ne.s16.totalorder %v222_v22, 0  ;;  %vm228_vm10 = vcmp.ne.s16.totalorder %v226_v23, 0  ;;  %vm311_vm3 = vmpackc.low %vm189_vm2, %vm188_vm1 }
  0x17   : > { %v365_v51 = vsel %vm364_vm0, 65537, %v697_v3  ;;  %v312_v54 = vsel %vm311_vm3, 65537, %v697_v3 }
  0x18   : > { %250 = vrot.lane.b32.xlu1 %v200_v10, %s698_s19  ;;  %vm274_vm6 = vcmp.ne.s16.totalorder %v269_v19, 0  ;;  %vm275_vm7 = vcmp.ne.s16.totalorder %v273_v20, 0  ;;  %v369_v52 = vrot.slane %v365_v51, %v748_v15  ;;  %v373_v53 = vrot.slane %v365_v51, %v750_v16  ;;  %v685_v19 = vld [vmem:[%s797_s1 + $0x8] sm:$0xff]  }
  0x19   : > { %v316_v55 = vrot.slane %v312_v54, %v748_v15  ;;  %v320_v56 = vrot.slane %v312_v54, %v750_v16 }
  0x1a   : > { %203 = vrot.lane.b32.xlu0 %v199_v8, %s699_s20 }
  0x86   : > { %v249_v21 = vpop.permute.xlu1 %248 }
  0x88   : > { %v202_v24 = vpop.permute.xlu0 %201 }
  0x8a   : > { %v251_v25 = vpop.permute.xlu1 %250 }
  0x8b   : > { %v253_v26 = vsel %vm252_vm5, %v249_v21, %v251_v25  ;;  %v258_v27 = vsel %vm252_vm5, %v251_v25, %v249_v21  ;;  %vm374_vm5 = vcmp.ne.s16.totalorder %v369_v52, 0 }
  0x8c   : > { %v276_v28 = vsel %vm274_vm6, %v253_v26, 0  ;;  %v277_v29 = vsel %vm275_vm7, %v258_v27, 0  ;;  %v204_v30 = vpop.permute.xlu0 %203  ;;  %vm375_vm6 = vcmp.ne.s16.totalorder %v373_v53, 0  ;;  %vm299_vm7 = vcmask 7168  }
  0x8d   : > { %v627_v31 = vcombine.low %v276_v28, %v277_v29  ;;  %v206_v32 = vsel %vm205_vm8, %v204_v30, %v202_v24  ;;  %v211_v33 = vsel %vm205_vm8, %v202_v24, %v204_v30  ;;  %vm321_vm8 = vcmp.ne.s16.totalorder %v316_v55, 0 }
  0x8e   : > { %v229_v34 = vsel %vm227_vm9, %v211_v33, 0  ;;  %v230_v35 = vsel %vm228_vm10, %v206_v32, 0  ;;  %vm322_vm9 = vcmp.ne.s16.totalorder %v320_v56, 0  ;;  %vm458_vm10 = vcmask 293888  }
  0x8f   : > { %284 = vst [vmem:[#allocation2 + $0x8] sm:$0x33] %v627_v31  ;;  %v625_v36 = vcombine.low %v229_v34, %v230_v35 }
  0x91   : > { %237 = vst [vmem:[#allocation2] sm:$0x33] %v625_v36 }
  0x96   : > { %v286_v38 = vld [vmem:[#allocation2 + $0x8] sm:$0x33] }
  0x97   : > { %v342_v43 = vrot.slane %v286_v38, 6 }
  0x98   : > { %v285_v37 = vld [vmem:[#allocation2] sm:$0xff] }
  0x99   : > { %v629_v39 = vcombine.low %v285_v37, %v286_v38  ;;  %v340_v40 = vrot.slane %v285_v37, 6  ;;  %v628_v41 = vcombine.high %v285_v37, %v286_v38 }
  0x9b   : > { %v341_v42 = vrot.slane %v340_v40, 4  ;;  %346 = vst [vmem:[#allocation3] sm:$0xcc] %v340_v40  ;;  %348 = vrot.lane.b32.xlu0 %v629_v39, %s701_s21  ;;  %350 = vrot.lane.b32.xlu1 %v628_v41, %s701_s21 }
  0x9d   : > { %v343_v44 = vsel %vm339_vm13, %v341_v42, %v342_v43 }
  0x9f   : > { %292 = vrot.lane.b32.xlu0 %v628_v41, %s702_s22  ;;  %297 = vrot.lane.b32.xlu1 %v629_v39, %s702_s22 }
  0xa3   : > { %410 = vperm.xlu1 %678, %v400_v45   ;;  %405 = vperm.xlu0 %677, %v399_v46  }
  0xa7   : > { %415 = vperm.xlu1 %678, %v401_v47   ;;  %420 = vperm.xlu0 %677, %v402_v48  }
 0x10d   : > { %v349_v57 = vpop.permute.xlu0 %348  ;;  %v351_v58 = vpop.permute.xlu1 %350 }
 0x10e   : > { %v353_v59 = vsel %vm352_vm4, %v349_v57, %v351_v58  ;;  %v358_v60 = vsel %vm352_vm4, %v351_v58, %v349_v57 }
 0x10f   : > { %v376_v61 = vsel %vm374_vm5, %v353_v59, 0  ;;  %v377_v62 = vsel %vm375_vm6, %v358_v60, 0 }
 0x110   : > { %v632_v63 = vcombine.low %v376_v61, %v377_v62  ;;  %v633_v0 = vcombine.high %v376_v61, %v377_v62  ;;  %v686_v15 = vcombine.low %v343_v44, %v376_v61 }
 0x111   : > { %v293_v1 = vpop.permute.xlu0 %292  ;;  %v298_v2 = vpop.permute.xlu1 %297 }
 0x112   : > { %389 = vst [vmem:[#allocation3 + $0x18] sm:$0x33] %v633_v0  ;;  %v300_v3 = vsel %vm299_vm7, %v298_v2, %v293_v1  ;;  %v305_v4 = vsel %vm299_vm7, %v293_v1, %v298_v2  ;;  %v639_v13 = vcombine.high %v343_v44, %v632_v63 }
 0x113   : > { %v323_v5 = vsel %vm321_vm8, %v305_v4, 0  ;;  %v324_v6 = vsel %vm322_vm9, %v300_v3, 0 }
 0x114   : > { %v630_v7 = vcombine.low %v323_v5, %v324_v6  ;;  %v631_v8 = vcombine.high %v323_v5, %v324_v6 }
 0x116   : > { %336 = vst [vmem:[#allocation3] sm:$0x33] %v631_v8 }
 0x119   : > { %v398_v9 = vld [vmem:[#allocation3 + $0x18] sm:$0x33] }
 0x11a   : > { %v641_v10 = vcombine.high %v398_v9, %v398_v9  ;;  %v640_v11 = vcombine.low %v398_v9, %v398_v9 }
 0x11c   : > { %642 = vmatprep.subr.msk.bf16.mxu0 %vm337_vm11, %v641_v10  ;;  %656 = vmatprep.subr.msk.bf16.mxu1 %vm337_vm11, %v641_v10  ;;  %v467_v12 = vsel %vm337_vm11, %v640_v11, 0 }
 0x11d   : > { %483 = vmatpush1.bf16.msra.mxu0 %v467_v12  ;;  %659 = vmatpush1.bf16.msra.mxu1 %v467_v12  ;;  %v395_v14 = vld [vmem:[#allocation3] sm:$0xff] }
 0x11e   : > { %484 = vmatprep.subr.bf16.mxu0 %v639_v13  ;;  %657 = vmatprep.subr.bf16.mxu1 %v639_v13  ;;  %v637_v16 = vcombine.high %v630_v7, %v395_v14  ;;  %v687_v17 = vcombine.low %v323_v5, %v395_v14  ;;  %v411_v20 = vpop.permute.xlu1 %410  ;;  %v406_v22 = vpop.permute.xlu0 %405 }
 0x121   : > { %485 = vmatpush1.bf16.msra.mxu0 %v686_v15  ;;  %660 = vmatpush1.bf16.msra.mxu1 %v686_v15 }
 0x122   : > { %486 = vmatprep.subr.bf16.mxu0 %v637_v16  ;;  %658 = vmatprep.subr.bf16.mxu1 %v637_v16  ;;  %v416_v21 = vpop.permute.xlu1 %415  ;;  %v421_v35 = vpop.permute.xlu0 %420 }
 0x125   : > { %487 = vmatpush1.bf16.msra.mxu0 %v687_v17  ;;  %661 = vmatpush1.bf16.msra.mxu1 %v687_v17 }
 0x128   : > { %643 = vmatmul.mubr.msk.bf16.vlgmr.msra.gmra.mxu0 %vm458_vm10, %v684_v18  ;;  %644 = vmatmul.mubr.msk.bf16.vlgmr.msra.gmra.mxu1 %vm458_vm10, %v685_v19 }
 0x1e8   : > { %v506_v23 = vpop.f32.mrf.mxu0  ;;  %v516_v24 = vpop.f32.mrf.mxu1 }
 0x1e9   : > { %v507_v25 = vadd.f32 %v506_v23, %v406_v22  ;;  %v517_v26 = vadd.f32 %v516_v24, %v416_v21 }
 0x1ea   : > { %v508_v27 = vpop.f32.mrf.mxu0  ;;  %v518_v28 = vpop.f32.mrf.mxu1 }
 0x1eb   : > { %v509_v29 = vadd.f32 %v508_v27, %v406_v22  ;;  %v519_v30 = vadd.f32 %v518_v28, %v416_v21  ;;  %v525_v33 = vmax.f32 %v507_v25, 0.0  ;;  %v529_v34 = vmax.f32 %v517_v26, 0.0 }
 0x1ec   : > { %v510_v31 = vpop.f32.mrf.mxu0  ;;  %v520_v32 = vpop.f32.mrf.mxu1 }
 0x1ed   : > { %v526_v36 = vmax.f32 %v509_v29, 0.0  ;;  %v530_v37 = vmax.f32 %v519_v30, 0.0  ;;  %v511_v38 = vadd.f32 %v510_v31, %v411_v20  ;;  %v521_v39 = vadd.f32 %v520_v32, %v421_v35 }
 0x1ee   : > { %v512_v40 = vpop.f32.mrf.mxu0  ;;  %v522_v41 = vpop.f32.mrf.mxu1 }
 0x1ef   : > { %v652_v42 = vpack.c.bf16 %v526_v36, %v525_v33  ;;  %v654_v43 = vpack.c.bf16 %v530_v37, %v529_v34  ;;  %v513_v44 = vadd.f32 %v512_v40, %v411_v20  ;;  %v523_v45 = vadd.f32 %v522_v41, %v421_v35 }
 0x1f0   : > { %v527_v46 = vmax.f32 %v511_v38, 0.0  ;;  %v531_v47 = vmax.f32 %v521_v39, 0.0 }
 0x1f1   : > { %557 = vst [vmem:[%s172_s11] sm:$0xff] %v652_v42  ;;  %559 = vst [vmem:[%s172_s11 + $0x10] sm:$0xff] %v654_v43  ;;  %v528_v48 = vmax.f32 %v513_v44, 0.0  ;;  %v532_v49 = vmax.f32 %v523_v45, 0.0 }
 0x1f3   : > { %v653_v50 = vpack.c.bf16 %v528_v48, %v527_v46  ;;  %v655_v51 = vpack.c.bf16 %v532_v49, %v531_v47 }
 0x1f5   : > { %558 = vst [vmem:[%s172_s11 + $0x8] sm:$0xff] %v653_v50  ;;  %560 = vst [vmem:[%s172_s11 + $0x18] sm:$0xff] %v655_v51 }
 0x1f6 PF: > { %s13_s12 = sadd.s32 1, %s694_s12  }
 0x1f7   : > { %p10_p5 = scmp.ge.s32.totalorder %s13_s12, 4  }
 0x1f9   :  { %12 = sbr.rel (!%p10_p5) target bundleno = 1 (0x1), region = 62 }

</bundles_post_ra>
